<compile_context>
chip_gen: v7x
topology: tpu7x:2x2x1
jax: 0.10.0
libtpu: 0.0.40
codegen_flags: <defaults>
</compile_context>

<pallas_src>
import functools

import jax
import jax.numpy as jnp
import numpy as np
from jax.experimental import pallas as pl
from jax.experimental.pallas import tpu as pltpu

_MIB = 1024 * 1024


# ---------------------------------------------------------------------------
# helpers
# ---------------------------------------------------------------------------
def _round_up(x, m):
    return ((x + m - 1) // m) * m


def _pad2d(a, rows, cols):
    pr, pc = rows - a.shape[0], cols - a.shape[1]
    if pr or pc:
        a = jnp.pad(a, ((0, pr), (0, pc)))
    return a


def _vmem_budget_bytes():
    """Generation-aware VMEM budget: ~75% of physical VMEM (96 MiB on
    v5e/v6e's 128 MiB, 48 MiB on v7x's 64 MiB per TC); conservative 48 MiB
    if the hardware query fails."""
    cap = None
    try:
        info = pltpu.get_tpu_info()
        for name in ("vmem_capacity_bytes", "vmem_bytes", "vmem_size_bytes"):
            val = getattr(info, name, None)
            if val:
                cap = int(val)
                break
    except Exception:
        cap = None
    if not cap:
        cap = 64 * _MIB
    return int(min(cap * 3 // 4, 112 * _MIB))


def _vmem_limit(need, budget):
    """Scoped-VMEM limit: always >= the estimated need (with margin) and at
    least the 32 MiB floor, but never blown past the generation budget."""
    floor = 32 * _MIB
    return int(min(max(need * 5 // 4, floor), max(budget * 7 // 6, floor)))


def _pick_block(dim, target, align, other):
    """Pick (block, padded_dim) for one adj axis.

    Prefers exact divisors of the (8/128-aligned) dim so adj is not
    re-padded/copied in HBM; pads up only when the padded-element waste
    (each padded row/col costs ~`other` extra elements of adj traffic) is
    cheaper than the extra per-grid-step overhead."""
    step_cost = 100_000          # padded elements "equivalent" to one grid step
    target = max(align, (min(target, dim + align - 1) // align) * align)
    best = None
    b = target
    while b >= align:
        padded = _round_up(dim, b)
        cost = (padded - dim) * other + (padded // b) * step_cost
        if best is None or cost < best[0]:
            best = (cost, b, padded)
        b -= align
    return best[1], best[2]


def _largest_divisor(dim, target, align):
    t = max(align, (min(target, dim) // align) * align)
    while t > align and dim % t:
        t -= align
    return t


# ---------------------------------------------------------------------------
# kernels
# ---------------------------------------------------------------------------
def _fused_kernel(has_bias, block_k, adj_ref, x_ref, w_ref, *rest):
    """out[i] = sum_k adj[i, k] @ (x[k] @ W)  (+ bias); x/W VMEM-resident."""
    if has_bias:
        b_ref, o_ref, acc_ref = rest
    else:
        o_ref, acc_ref = rest
    k = pl.program_id(1)

    @pl.when(k == 0)
    def _():
        acc_ref[...] = jnp.zeros_like(acc_ref)

    row0 = pl.multiple_of(k * block_k, 128)
    # support tile recomputed on the MXU (cheap) instead of round-tripping HBM.
    s_tile = jnp.dot(x_ref[pl.ds(row0, block_k), :], w_ref[...],
                     preferred_element_type=jnp.float32)
    acc_ref[...] += jnp.dot(adj_ref[...], s_tile.astype(adj_ref.dtype),
                            preferred_element_type=jnp.float32)

    @pl.when(k == pl.num_programs(1) - 1)
    def _():
        out = acc_ref[...]
        if has_bias:
            out = out + b_ref[...]          # bias add stays f32 (VPU)
        o_ref[...] = out.astype(o_ref.dtype)


def _support_kernel(x_ref, w_ref, s_ref):
    """Fallback stage 1 (tiled over rows): support = x @ W."""
    s_ref[...] = jnp.dot(x_ref[...], w_ref[...],
                         preferred_element_type=jnp.float32).astype(s_ref.dtype)


def _aggregate_kernel(has_bias, support_resident, block_k, adj_ref, s_ref, *rest):
    """Fallback stage 2: out = adj @ support (+ bias), reduction over axis 1."""
    if has_bias:
        b_ref, o_ref, acc_ref = rest
    else:
        o_ref, acc_ref = rest
    k = pl.program_id(1)

    @pl.when(k == 0)
    def _():
        acc_ref[...] = jnp.zeros_like(acc_ref)

    if support_resident:
        s_tile = s_ref[pl.ds(pl.multiple_of(k * block_k, 128), block_k), :]
    else:
        s_tile = s_ref[...]
    acc_ref[...] += jnp.dot(adj_ref[...], s_tile,
                            preferred_element_type=jnp.float32)

    @pl.when(k == pl.num_programs(1) - 1)
    def _():
        out = acc_ref[...]
        if has_bias:
            out = out + b_ref[...]
        o_ref[...] = out.astype(o_ref.dtype)


# ---------------------------------------------------------------------------
# paths
# ---------------------------------------------------------------------------
def _gcn_fused(x_c, adj_c, w_c, bias2d, N, f_out, f_in_p, f_out_p,
               out_dtype, block_m, block_k, budget):
    """Single fused call: x/W resident, adj streamed, out accumulated in VMEM."""
    compute_dtype = x_c.dtype
    it = jnp.dtype(compute_dtype).itemsize
    out_it = jnp.dtype(out_dtype).itemsize
    has_bias = bias2d is not None

    bm_t, bk_t = block_m, block_k
    while True:
        bm, nrp = _pick_block(N, bm_t, 8, N)      # adj / output row tiles
        bk, ncp = _pick_block(N, bk_t, 128, N)    # adj col == x row tiles
        # x and W are full-array blocks with constant index maps (fetched
        # once); budget them double-buffered to stay conservative.
        resident = 2 * (ncp * f_in_p + f_in_p * f_out_p) * it
        need = (resident
                + 2 * bm * bk * it               # streamed adj tiles
                + 2 * bm * f_out_p * out_it      # output tile
                + bm * f_out_p * 4               # f32 accumulator scratch
                + bk * f_out_p * 4               # support-tile temporaries
                + 2 * f_out_p * 4)               # bias
        if need <= budget or (bm_t <= 8 and bk_t <= 128):
            break
        if bk_t > 128:
            bk_t = max(128, bk_t // 2)
        else:
            bm_t = max(8, bm_t // 2)
    if need > max(budget, 32 * _MIB):
        return None                              # residency does not fit

    block_m, block_k = bm, bk
    x_p = _pad2d(x_c, ncp, f_in_p)
    adj_p = _pad2d(adj_c, nrp, ncp)
    w_p = _pad2d(w_c, f_in_p, f_out_p)

    in_specs = [pl.BlockSpec((block_m, block_k), lambda i, k: (i, k)),  # adj: streamed
                pl.BlockSpec((ncp, f_in_p), lambda i, k: (0, 0)),       # x: resident
                pl.BlockSpec((f_in_p, f_out_p), lambda i, k: (0, 0))]   # W: resident
    operands = [adj_p, x_p, w_p]
    if has_bias:
        in_specs.append(pl.BlockSpec((1, f_out_p), lambda i, k: (0, 0)))
        operands.append(_pad2d(bias2d, 1, f_out_p))

    out = pl.pallas_call(
        functools.partial(_fused_kernel, has_bias, block_k),
        out_shape=jax.ShapeDtypeStruct((nrp, f_out_p), out_dtype),
        grid=(nrp // block_m, ncp // block_k),    # reduction axis last
        in_specs=in_specs,
        out_specs=pl.BlockSpec((block_m, f_out_p), lambda i, k: (i, 0)),
        scratch_shapes=[pltpu.VMEM((block_m, f_out_p), jnp.float32)],
        compiler_params=pltpu.CompilerParams(
            dimension_semantics=("parallel", "arbitrary"),   # megacore on rows
            vmem_limit_bytes=_vmem_limit(need, budget)),
    )(*operands)
    return out[:N, :f_out]


def _gcn_two_stage(x_c, adj_c, w_c, bias2d, N, f_out, f_in_p, f_out_p,
                   out_dtype, block_m, block_k, budget):
    """Fallback when x/W residency does not fit: support via HBM."""
    compute_dtype = x_c.dtype
    it = jnp.dtype(compute_dtype).itemsize
    out_it = jnp.dtype(out_dtype).itemsize
    has_bias = bias2d is not None

    bm_t, bk_t = block_m, block_k
    while True:
        bm, nrp = _pick_block(N, bm_t, 8, N)
        bk, ncp = _pick_block(N, bk_t, 128, N)
        base = (2 * bm * bk * it + 2 * bm * f_out_p * out_it
                + bm * f_out_p * 4 + 2 * f_out_p * 4)
        s_res = 2 * ncp * f_out_p * it
        support_resident = base + s_res <= budget    # keep support in VMEM once
        need2 = base + (s_res if support_resident else 2 * bk * f_out_p * it)
        if need2 <= budget or (bm_t <= 8 and bk_t <= 128):
            break
        if bk_t > 128:
            bk_t = max(128, bk_t // 2)
        else:
            bm_t = max(8, bm_t // 2)
    block_m, block_k = bm, bk

    x_p = _pad2d(x_c, ncp, f_in_p)
    adj_p = _pad2d(adj_c, nrp, ncp)
    w_p = _pad2d(w_c, f_in_p, f_out_p)

    # ---- Stage 1: support = x @ W (W resident, large row tiles). -----------
    per_row = 2 * (f_in_p + f_out_p) * it + f_out_p * 4
    avail = max(budget * 3 // 5 - 2 * f_in_p * f_out_p * it, 8 * per_row)
    rows1 = _largest_divisor(ncp, min(2048, avail // per_row // 8 * 8), 8)
    need1 = (2 * rows1 * f_in_p * it + 2 * f_in_p * f_out_p * it
             + 2 * rows1 * f_out_p * it + rows1 * f_out_p * 4)
    support = pl.pallas_call(
        _support_kernel,
        out_shape=jax.ShapeDtypeStruct((ncp, f_out_p), compute_dtype),
        grid=(ncp // rows1,),
        in_specs=[pl.BlockSpec((rows1, f_in_p), lambda i: (i, 0)),
                  pl.BlockSpec((f_in_p, f_out_p), lambda i: (0, 0))],
        out_specs=pl.BlockSpec((rows1, f_out_p), lambda i: (i, 0)),
        compiler_params=pltpu.CompilerParams(
            dimension_semantics=("parallel",),
            vmem_limit_bytes=_vmem_limit(need1, budget)),
    )(x_p, w_p)

    # ---- Stage 2: out = adj @ support (+ bias), reduction axis last. -------
    if support_resident:
        s_spec = pl.BlockSpec((ncp, f_out_p), lambda i, k: (0, 0))   # DMA'd once
    else:
        s_spec = pl.BlockSpec((block_k, f_out_p), lambda i, k: (k, 0))
    in_specs = [pl.BlockSpec((block_m, block_k), lambda i, k: (i, k)), s_spec]
    operands = [adj_p, support]
    if has_bias:
        in_specs.append(pl.BlockSpec((1, f_out_p), lambda i, k: (0, 0)))
        operands.append(_pad2d(bias2d, 1, f_out_p))

    out = pl.pallas_call(
        functools.partial(_aggregate_kernel, has_bias, support_resident, block_k),
        out_shape=jax.ShapeDtypeStruct((nrp, f_out_p), out_dtype),
        grid=(nrp // block_m, ncp // block_k),
        in_specs=in_specs,
        out_specs=pl.BlockSpec((block_m, f_out_p), lambda i, k: (i, 0)),
        scratch_shapes=[pltpu.VMEM((block_m, f_out_p), jnp.float32)],
        compiler_params=pltpu.CompilerParams(
            dimension_semantics=("parallel", "arbitrary"),
            vmem_limit_bytes=_vmem_limit(need2, budget)),
    )(*operands)
    return out[:N, :f_out]


# ---------------------------------------------------------------------------
# public entry point (matches GraphConvolution.forward semantics)
# ---------------------------------------------------------------------------
def graph_convolution(x, adj, weight, bias=None, *, compute_dtype=None,
                      block_m=None, block_k=None, force_path=None,
                      vmem_budget_bytes=None):
    """Pallas-TPU GCN forward: adj @ (x @ weight) (+ bias).

    x: (N, F_in), adj: (N, N), weight: (F_in, F_out), bias: (F_out,) or None.
    compute_dtype feeds the MXU streams (pass jnp.bfloat16 on bandwidth-bound
    chips such as v5e for ~2x on the HBM-bound adj pass); accumulation and
    the bias add are always f32, and the output keeps x.dtype.
    """
    N, f_in = x.shape
    f_out = weight.shape[1]
    out_dtype = x.dtype
    compute_dtype = jnp.dtype(x.dtype if compute_dtype is None else compute_dtype)
    it = compute_dtype.itemsize

    # Lane-dense (multiple-of-128) feature dims -> unmasked vector stores.
    f_in_p = _round_up(f_in, 128)
    f_out_p = _round_up(f_out, 128)

    x_c = x.astype(compute_dtype)
    adj_c = adj.astype(compute_dtype)
    w_c = weight.astype(compute_dtype)
    bias2d = (bias.astype(jnp.float32).reshape(1, f_out)
              if bias is not None else None)

    budget = int(vmem_budget_bytes) if vmem_budget_bytes else _vmem_budget_bytes()
    big = budget >= 80 * _MIB                      # v5e/v6e (128 MiB VMEM)
    if block_m is None:
        block_m = 1024 if big else 512
    if block_k is None:
        block_k = 2048 if big else 1024

    args = (x_c, adj_c, w_c, bias2d, N, f_out, f_in_p, f_out_p, out_dtype,
            block_m, block_k, budget)

    resident_est = 2 * (_round_up(N, 128) * f_in_p + f_in_p * f_out_p) * it
    use_fused = resident_est <= budget * 3 // 5
    if force_path == "two_stage":
        use_fused = False
    elif force_path == "fused":
        use_fused = True

    out = _gcn_fused(*args) if use_fused else None
    if out is None:
        out = _gcn_two_stage(*args)
    return out


# ---------------------------------------------------------------------------
# self-test
# ---------------------------------------------------------------------------
if __name__ == "__main__":
    key = jax.random.PRNGKey(0)

    # --- Test 1: module config (in=16, out=32, bias), N=8, f32, default path.
    in_f, out_f, n1 = 16, 32, 8
    k_w, k_b, k_x, k_a, key = jax.random.split(key, 5)
    stdv = 1.0 / np.sqrt(out_f)
    w1 = jax.random.uniform(k_w, (in_f, out_f), jnp.float32, -stdv, stdv)
    b1 = jax.random.uniform(k_b, (out_f,), jnp.float32, -stdv, stdv)
    x1 = jax.random.normal(k_x, (n1, in_f), jnp.float32)
    a1 = jax.random.uniform(k_a, (n1, n1), jnp.float32)
    o1 = jax.block_until_ready(graph_convolution(x1, a1, w1, b1))
    r1 = (np.asarray(a1, np.float64)
          @ (np.asarray(x1, np.float64) @ np.asarray(w1, np.float64))
          + np.asarray(b1, np.float64)[None, :])
    np.testing.assert_allclose(np.asarray(o1, np.float64), r1,
                               rtol=1e-5, atol=1e-5)

    # --- Test 2: larger graph, fused path with a multi-step grid, bf16 streams.
    n2, fi2, fo2 = 640, 200, 120
    k_w, k_b, k_x, k_a, key = jax.random.split(key, 5)
    stdv2 = 1.0 / np.sqrt(fo2)
    w2 = jax.random.uniform(k_w, (fi2, fo2), jnp.float32, -stdv2, stdv2)
    b2 = jax.random.uniform(k_b, (fo2,), jnp.float32, -stdv2, stdv2)
    x2 = jax.random.normal(k_x, (n2, fi2), jnp.float32)
    a2 = jax.random.uniform(k_a, (n2, n2), jnp.float32)
    o2 = jax.block_until_ready(
        graph_convolution(x2, a2, w2, b2, compute_dtype=jnp.bfloat16,
                          block_m=256, block_k=256, force_path="fused"))
    xb = np.asarray(x2.astype(jnp.bfloat16).astype(jnp.float32), np.float64)
    ab = np.asarray(a2.astype(jnp.bfloat16).astype(jnp.float32), np.float64)
    wb = np.asarray(w2.astype(jnp.bfloat16).astype(jnp.float32), np.float64)
    supb = np.asarray(jnp.asarray((xb @ wb).astype(np.float32))
                      .astype(jnp.bfloat16).astype(jnp.float32), np.float64)
    r2 = ab @ supb + np.asarray(b2, np.float64)[None, :]
    np.testing.assert_allclose(np.asarray(o2, np.float64), r2,
                               rtol=2e-2, atol=2e-1)

    # --- Test 3: two-stage fallback, f32, no bias, VMEM-resident support.
    o3 = jax.block_until_ready(
        graph_convolution(x2, a2, w2, None, block_m=256, block_k=256,
                          force_path="two_stage"))
    x2d, a2d, w2d = (np.asarray(v, np.float64) for v in (x2, a2, w2))
    r3 = a2d @ (x2d @ w2d)
    np.testing.assert_allclose(np.asarray(o3, np.float64), r3,
                               rtol=1e-3, atol=1e-2)

    # --- Test 4: two-stage fallback under a tiny VMEM budget (streamed
    #     support, shrunken tiles, multi-tile stage 1), f32, with bias.
    o4 = jax.block_until_ready(
        graph_convolution(x2, a2, w2, b2, force_path="two_stage",
                          vmem_budget_bytes=1 * _MIB))
    r4 = a2d @ (x2d @ w2d) + np.asarray(b2, np.float64)[None, :]
    np.testing.assert_allclose(np.asarray(o4, np.float64), r4,
                               rtol=1e-3, atol=1e-2)

    print("KERNEL_OK")
</pallas_src>

<mosaic_0001>
module attributes {stable_mosaic.version = 11 : i64} {
  func.func @_fused_kernel(%arg0: i32, %arg1: i32, %arg2: memref<8x128xf32, #tpu.memory_space<vmem>>, %arg3: memref<128x128xf32, #tpu.memory_space<vmem>>, %arg4: memref<128x128xf32, #tpu.memory_space<vmem>>, %arg5: memref<1x128xf32, #tpu.memory_space<vmem>>, %arg6: memref<8x128xf32, #tpu.memory_space<vmem>>, %arg7: memref<8x128xf32, #tpu.memory_space<vmem>>) attributes {dimension_semantics = [#tpu.dimension_semantics<parallel>, #tpu.dimension_semantics<arbitrary>], iteration_bounds = array<i64: 1, 1>, scalar_prefetch = 0 : i64, scratch_operands = 1 : i64, tpu.core_type = #tpu.core_type<tc>, window_params = [{transform_indices = @transform_0, window_bounds = array<i64: 8, 128>}, {pipeline_mode = #tpu.pipeline_mode<synchronous>, transform_indices = @transform_1, window_bounds = array<i64: 128, 128>}, {pipeline_mode = #tpu.pipeline_mode<synchronous>, transform_indices = @transform_2, window_bounds = array<i64: 128, 128>}, {pipeline_mode = #tpu.pipeline_mode<synchronous>, transform_indices = @transform_3, window_bounds = array<i64: 1, 128>}, {transform_indices = @transform_4, window_bounds = array<i64: 8, 128>}]} {
    %c0_i32 = arith.constant 0 : i32
    %0 = arith.cmpi eq, %arg1, %c0_i32 : i32
    %1 = arith.extui %0 : i1 to i32
    %c0_i32_0 = arith.constant 0 : i32
    %2 = arith.cmpi ne, %1, %c0_i32_0 : i32
    scf.if %2 {
      %cst_12 = arith.constant 0.000000e+00 : f32
      %17 = vector.broadcast %cst_12 : f32 to vector<8x128xf32>
      %c0_13 = arith.constant 0 : index
      %c0_14 = arith.constant 0 : index
      %18 = vector.load %arg7[%c0_13, %c0_14] : memref<8x128xf32, #tpu.memory_space<vmem>>, vector<8x128xf32>
      tpu.vector_store %arg7[%c0_13, %c0_14], %17 {strides = array<i32>} : memref<8x128xf32, #tpu.memory_space<vmem>>, vector<8x128xf32>,
    } else {
    }
    %c128_i32 = arith.constant 128 : i32
    %3 = arith.muli %arg1, %c128_i32 : i32
    %4 = tpu.assume_multiple %3, 128 : i32
    %5 = arith.index_cast %4 : i32 to index
    %c0 = arith.constant 0 : index
    %6 = vector.load %arg3[%5, %c0] : memref<128x128xf32, #tpu.memory_space<vmem>>, vector<128x128xf32>
    %c0_1 = arith.constant 0 : index
    %c0_2 = arith.constant 0 : index
    %7 = vector.load %arg4[%c0_1, %c0_2] : memref<128x128xf32, #tpu.memory_space<vmem>>, vector<128x128xf32>
    %cst = arith.constant dense<0.000000e+00> : vector<128x128xf32>
    %8 = tpu.matmul %6, %7, %cst {dimension_numbers = #tpu.dot_dimension_numbers<[1], [0], [0], [1], [0, 0, 1, 1], [], []>} : vector<128x128xf32>, vector<128x128xf32>, vector<128x128xf32> -> vector<128x128xf32>
    %c0_3 = arith.constant 0 : index
    %c0_4 = arith.constant 0 : index
    %9 = vector.load %arg7[%c0_3, %c0_4] : memref<8x128xf32, #tpu.memory_space<vmem>>, vector<8x128xf32>
    %c0_5 = arith.constant 0 : index
    %c0_6 = arith.constant 0 : index
    %10 = vector.load %arg2[%c0_5, %c0_6] : memref<8x128xf32, #tpu.memory_space<vmem>>, vector<8x128xf32>
    %cst_7 = arith.constant dense<0.000000e+00> : vector<8x128xf32>
    %11 = tpu.matmul %10, %8, %cst_7 {dimension_numbers = #tpu.dot_dimension_numbers<[1], [0], [0], [1], [0, 0, 1, 1], [], []>} : vector<8x128xf32>, vector<128x128xf32>, vector<8x128xf32> -> vector<8x128xf32>
    %12 = arith.addf %9, %11 : vector<8x128xf32>
    %c0_8 = arith.constant 0 : index
    %c0_9 = arith.constant 0 : index
    %13 = vector.load %arg7[%c0_8, %c0_9] : memref<8x128xf32, #tpu.memory_space<vmem>>, vector<8x128xf32>
    tpu.vector_store %arg7[%c0_8, %c0_9], %12 {strides = array<i32>} : memref<8x128xf32, #tpu.memory_space<vmem>>, vector<8x128xf32>,
    %c0_i32_10 = arith.constant 0 : i32
    %14 = arith.cmpi eq, %arg1, %c0_i32_10 : i32
    %15 = arith.extui %14 : i1 to i32
    %c0_i32_11 = arith.constant 0 : i32
    %16 = arith.cmpi ne, %15, %c0_i32_11 : i32
    scf.if %16 {
      %c0_12 = arith.constant 0 : index
      %c0_13 = arith.constant 0 : index
      %17 = vector.load %arg7[%c0_12, %c0_13] : memref<8x128xf32, #tpu.memory_space<vmem>>, vector<8x128xf32>
      %c0_14 = arith.constant 0 : index
      %c0_15 = arith.constant 0 : index
      %18 = vector.load %arg5[%c0_14, %c0_15] : memref<1x128xf32, #tpu.memory_space<vmem>>, vector<1x128xf32>
      %19 = vector.broadcast %18 : vector<1x128xf32> to vector<8x128xf32>
      %20 = arith.addf %17, %19 : vector<8x128xf32>
      %c0_16 = arith.constant 0 : index
      %c0_17 = arith.constant 0 : index
      %21 = vector.load %arg6[%c0_16, %c0_17] : memref<8x128xf32, #tpu.memory_space<vmem>>, vector<8x128xf32>
      tpu.vector_store %arg6[%c0_16, %c0_17], %20 {strides = array<i32>} : memref<8x128xf32, #tpu.memory_space<vmem>>, vector<8x128xf32>,
    } else {
    }
    return
  }
  func.func @transform_0(%arg0: i32, %arg1: i32) -> (i32, i32) {
    %c0_i32 = arith.constant 0 : i32
    return %arg0, %arg1 : i32, i32
  }
  func.func @transform_1(%arg0: i32, %arg1: i32) -> (i32, i32) {
    %c0_i32 = arith.constant 0 : i32
    %c0_i32_0 = arith.constant 0 : i32
    %c0_i32_1 = arith.constant 0 : i32
    return %c0_i32, %c0_i32_0 : i32, i32
  }
  func.func @transform_2(%arg0: i32, %arg1: i32) -> (i32, i32) {
    %c0_i32 = arith.constant 0 : i32
    %c0_i32_0 = arith.constant 0 : i32
    %c0_i32_1 = arith.constant 0 : i32
    return %c0_i32, %c0_i32_0 : i32, i32
  }
  func.func @transform_3(%arg0: i32, %arg1: i32) -> (i32, i32) {
    %c0_i32 = arith.constant 0 : i32
    %c0_i32_0 = arith.constant 0 : i32
    %c0_i32_1 = arith.constant 0 : i32
    return %c0_i32, %c0_i32_0 : i32, i32
  }
  func.func @transform_4(%arg0: i32, %arg1: i32) -> (i32, i32) {
    %c0_i32 = arith.constant 0 : i32
    %c0_i32_0 = arith.constant 0 : i32
    return %arg0, %c0_i32 : i32, i32
  }
}

</mosaic_0001>

<bundles_post_ra>
// kernel: tpu_custom_call.1
= control target key start
LH: loop header
LB: loop body
LE: loop exit
PB: predicated region body
PF: predicated region fallthrough
CT: control target
= control target key end

     0   :  { %9 = vsyncpa [#allocation4], 0  ;;  %s735_s0 = inlined_call_operand.hbm [shape: f32[8,128], index: 0, kind: input, shape index: {}]   ;;  %s736_s1 = inlined_call_operand.hbm [shape: f32[128,128], index: 1, kind: input, shape index: {}]   ;;  %s737_s2 = inlined_call_operand.hbm [shape: f32[128,128], index: 2, kind: input, shape index: {}]   ;;  %s738_s3 = inlined_call_operand.vmem [shape: f32[1,128], index: 3, kind: input, shape index: {}]   ;;  %s739_s4 = inlined_call_operand.hbm [shape: f32[8,128], index: 4, kind: output, shape index: {}]  }
   0x1   :  { %10 = vsyncpa [#allocation7], 0 }
   0x2   :  { %11 = vsyncpa [#allocation5], 0  ;;  %s644_s15 = smov [#allocation6]   ;;  %s550_s19 = scalar_lea.hbm %s736_s1, 2048 }
   0x3   :  { %s27_s16 = sshll.u32 %s644_s15, 4  ;;  %p551_p0 = scmp.ne.s32.totalorder %s736_s1, %s550_s19  ;;  %s28_s16 = int_to_ptr.vmem [resolvable:$true] %s27_s16 }
   0x4   :  { %p554_p1 = scmp.lt.u32.totalorder %s550_s19, %s736_s1 }
   0x6   :  { %p556_p2 = pnand %p554_p1, %p551_p0 }
   0x8   :  { %559 = shalt.err (!%p556_p2)
}
   0x9   :  { %s560_s24 = scalar_lea.vmem %s28_s16, 2048  ;;  %p565_p4 = scmp.lt.s32.totalorder %s28_s16, %s28_s16 }
   0xa   :  { %p561_p3 = scmp.ne.s32.totalorder %s28_s16, %s560_s24  ;;  %p566_p5 = scmp.lt.s32.totalorder %s560_s24, %s560_s24 }
   0xc   :  { %p567_p6 = por %p566_p5, %p565_p4 }
   0xe   :  { %p568_p7 = pnand %p567_p6, %p561_p3 }
  0x10   :  { %571 = shalt.err (!%p568_p7)
}
  0x11   :  { %s645_s25 = smov 128   ;;  %s646_s26 = smov 8  }
  0x12   :  { %33 = dma.hbm_to_vmem [thread:$0]  %s736_s1, 2048, %s28_s16, [#allocation7], %s645_s25, %s645_s25, %s646_s26  }
  0x13   :  { %s647_s29 = smov [#allocation3]   ;;  %s648_s5 = smov [#allocation8]  }
  0x14   :  { %s18_s30 = sshll.u32 %s647_s29, 4  ;;  %s39_s6 = sshll.u32 %s648_s5, 4  ;;  %s19_s30 = int_to_ptr.vmem [resolvable:$true] %s18_s30  ;;  %s40_s6 = int_to_ptr.vmem [resolvable:$true] %s39_s6 }
  0x15   :  { %s572_s9 = scalar_lea.hbm %s735_s0, 128 }
  0x16   :  { %p573_p8 = scmp.ne.s32.totalorder %s735_s0, %s572_s9  ;;  %p576_p9 = scmp.lt.u32.totalorder %s572_s9, %s735_s0 }
  0x18   :  { %p578_p10 = pnand %p576_p9, %p573_p8 }
  0x1a   :  { %581 = shalt.err (!%p578_p10)
}
  0x1b   :  { %s582_s1 = scalar_lea.vmem %s19_s30, 128  ;;  %p587_p12 = scmp.lt.s32.totalorder %s19_s30, %s19_s30 }
  0x1c   :  { %p583_p11 = scmp.ne.s32.totalorder %s19_s30, %s582_s1  ;;  %p588_p13 = scmp.lt.s32.totalorder %s582_s1, %s582_s1 }
  0x1e   :  { %p589_p0 = por %p588_p13, %p587_p12 }
  0x20   :  { %p590_p1 = pnand %p589_p0, %p583_p11 }
  0x22   :  { %593 = shalt.err (!%p590_p1)
}
  0x23   :  { %21 = dma.hbm_to_vmem [thread:$0]  %s735_s0, 128, %s19_s30, [#allocation4]  }
  0x24   :  { %s594_s18 = scalar_lea.hbm %s737_s2, 2048 }
  0x25   :  { %p595_p2 = scmp.ne.s32.totalorder %s737_s2, %s594_s18  ;;  %p598_p3 = scmp.lt.u32.totalorder %s594_s18, %s737_s2 }
  0x27   :  { %p600_p4 = pnand %p598_p3, %p595_p2 }
  0x29   :  { %603 = shalt.err (!%p600_p4)
}
  0x2a   :  { %s604_s23 = scalar_lea.vmem %s40_s6, 2048  ;;  %p609_p6 = scmp.lt.s32.totalorder %s40_s6, %s40_s6 }
  0x2b   :  { %p605_p5 = scmp.ne.s32.totalorder %s40_s6, %s604_s23  ;;  %p610_p7 = scmp.lt.s32.totalorder %s604_s23, %s604_s23 }
  0x2d   :  { %p611_p8 = por %p610_p7, %p609_p6 }
  0x2f   :  { %p612_p9 = pnand %p611_p8, %p605_p5 }
  0x31   :  { %615 = shalt.err (!%p612_p9)
}
  0x32   :  { %45 = dma.hbm_to_vmem [thread:$0]  %s737_s2, 2048, %s40_s6, [#allocation7], %s645_s25, %s645_s25, %s646_s26  }
  0x33   :  { %638 = dma.done.wait [#allocation4], 128  }
  0x34   :  { %639 = vsyncadd [#allocation4], 4294967168 }
  0x35   :  { %640 = dma.done.wait [#allocation7], 4096  }
  0x36   :  { %641 = vsyncadd [#allocation7], 4294963200  ;;  %v80_v0 = vld [vmem:[#allocation8] sm:$0xff]  ;;  %v81_v1 = vld [vmem:[#allocation8 + $0x8] sm:$0xff]  ;;  %v649_v40 = vmov 0.0|0.0   ;;  %vm650_vm0 = vmmov 0  }
  0x37   :  { %v82_v2 = vld [vmem:[#allocation8 + $0x10] sm:$0xff]  ;;  %v485_v3 = vpack.c.bf16 %v81_v1, %v80_v0  ;;  %v83_v4 = vld [vmem:[#allocation8 + $0x18] sm:$0xff]  ;;  %v84_v6 = vld [vmem:[#allocation8 + $0x20] sm:$0xff]  ;;  %517 = vmatprep.subr.bf16.mxu1 %v649_v40  ;;  %v651_v41 = vmov 0.0   ;;  %s652_s26 = smov [#allocation9]  }
  0x38   :  { %v489_v5 = vpack.c.bf16 %v83_v4, %v82_v2  ;;  %v85_v7 = vld [vmem:[#allocation8 + $0x28] sm:$0xff]  ;;  %v64_v9 = vld [vmem:[#allocation6] sm:$0xff]  ;;  %v86_v10 = vld [vmem:[#allocation8 + $0x30] sm:$0xff]  ;;  %482 = vmatprep.mubr.msk.f32.mxu1 %vm650_vm0, %v651_v41  ;;  %s334_s27 = sshll.u32 %s652_s26, 4  ;;  %s335_s27 = int_to_ptr.vmem [resolvable:$true] %s334_s27 }
  0x39   :  { %486 = vmatprep.subr.bf16.mxu0 %v485_v3  ;;  %v493_v8 = vpack.c.bf16 %v85_v7, %v84_v6  ;;  %v87_v11 = vld [vmem:[#allocation8 + $0x38] sm:$0xff]  ;;  %426 = vmatprep.mubr.f32.mxu0 %v64_v9  ;;  %v88_v13 = vld [vmem:[#allocation8 + $0x40] sm:$0xff]  ;;  %v89_v14 = vld [vmem:[#allocation8 + $0x48] sm:$0xff]  ;;  %s616_s28 = scalar_lea.vmem %s335_s27, 128  ;;  %p621_p11 = scmp.lt.s32.totalorder %s335_s27, %s335_s27 }
  0x3a   :  { %488 = vmatpush3.bf16.msra.mxu0 %v485_v3  ;;  %v497_v12 = vpack.c.bf16 %v87_v11, %v86_v10  ;;  %v501_v15 = vpack.c.bf16 %v89_v14, %v88_v13  ;;  %v90_v16 = vld [vmem:[#allocation8 + $0x50] sm:$0xff]  ;;  %v91_v17 = vld [vmem:[#allocation8 + $0x58] sm:$0xff]  ;;  %v92_v19 = vld [vmem:[#allocation8 + $0x60] sm:$0xff]  ;;  %p617_p10 = scmp.ne.s32.totalorder %s335_s27, %s616_s28  ;;  %p622_p12 = scmp.lt.s32.totalorder %s616_s28, %s616_s28 }
  0x3b   :  { %490 = vmatprep.subr.bf16.mxu0 %v489_v5  ;;  %v505_v18 = vpack.c.bf16 %v91_v17, %v90_v16  ;;  %v93_v20 = vld [vmem:[#allocation8 + $0x68] sm:$0xff]  ;;  %v94_v22 = vld [vmem:[#allocation8 + $0x70] sm:$0xff]  ;;  %v95_v23 = vld [vmem:[#allocation8 + $0x78] sm:$0xff] }
  0x3c   :  { %v509_v21 = vpack.c.bf16 %v93_v20, %v92_v19  ;;  %v513_v24 = vpack.c.bf16 %v95_v23, %v94_v22  ;;  %v65_v25 = vld [vmem:[#allocation6 + $0x8] sm:$0xff]  ;;  %v66_v26 = vld [vmem:[#allocation6 + $0x10] sm:$0xff]  ;;  %v67_v27 = vld [vmem:[#allocation6 + $0x18] sm:$0xff]  ;;  %p623_p13 = por %p622_p12, %p621_p11 }
  0x3d   :  { %v68_v28 = vld [vmem:[#allocation6 + $0x20] sm:$0xff]  ;;  %v69_v29 = vld [vmem:[#allocation6 + $0x28] sm:$0xff]  ;;  %v70_v30 = vld [vmem:[#allocation6 + $0x30] sm:$0xff] }
  0x3e   :  { %492 = vmatpush3.bf16.msra.mxu0 %v489_v5  ;;  %v71_v31 = vld [vmem:[#allocation6 + $0x38] sm:$0xff]  ;;  %v72_v32 = vld [vmem:[#allocation6 + $0x40] sm:$0xff]  ;;  %v73_v33 = vld [vmem:[#allocation6 + $0x48] sm:$0xff]  ;;  %p624_p0 = pnand %p623_p13, %p617_p10 }
  0x3f   :  { %494 = vmatprep.subr.bf16.mxu0 %v493_v8  ;;  %v74_v34 = vld [vmem:[#allocation6 + $0x50] sm:$0xff]  ;;  %v75_v35 = vld [vmem:[#allocation6 + $0x58] sm:$0xff]  ;;  %v76_v36 = vld [vmem:[#allocation6 + $0x60] sm:$0xff] }
  0x40   :  { %v77_v37 = vld [vmem:[#allocation6 + $0x68] sm:$0xff]  ;;  %v78_v38 = vld [vmem:[#allocation6 + $0x70] sm:$0xff]  ;;  %v79_v39 = vld [vmem:[#allocation6 + $0x78] sm:$0xff] }
  0x41   :  { %v242_v2 = vld [vmem:[#allocation3] sm:$0xff] }
  0x42   :  { %496 = vmatpush3.bf16.msra.mxu0 %v493_v8  ;;  %v344_v3 = vld [vmem:[%s738_s3] ss:$0 sm:$0xff] }
  0x43   :  { %498 = vmatprep.subr.bf16.mxu0 %v497_v12 }
  0x46   :  { %500 = vmatpush3.bf16.msra.mxu0 %v497_v12 }
  0x47   :  { %502 = vmatprep.subr.bf16.mxu0 %v501_v15 }
  0x4a   :  { %504 = vmatpush3.bf16.msra.mxu0 %v501_v15 }
  0x4b   :  { %506 = vmatprep.subr.bf16.mxu0 %v505_v18 }
  0x4e   :  { %508 = vmatpush3.bf16.msra.mxu0 %v505_v18 }
  0x4f   :  { %510 = vmatprep.subr.bf16.mxu0 %v509_v21 }
  0x52   :  { %512 = vmatpush3.bf16.msra.mxu0 %v509_v21 }
  0x53   :  { %514 = vmatprep.subr.bf16.mxu0 %v513_v24 }
  0x56   :  { %516 = vmatpush3.bf16.msra.mxu0 %v513_v24 }
  0x59   :  { %427 = vmatmul.mubr.f32.vlgmr.msra.gmra.mrb[0].mxu0 %v65_v25 }
  0x5a   :  { %429 = vmatprep.mubr.f32.mxu0 %v66_v26 }
  0x5d   :  { %430 = vmatmul.mubr.f32.gmra.mrb[2].mxu0 %v67_v27 }
  0x5e   :  { %432 = vmatprep.mubr.f32.mxu0 %v68_v28 }
  0x61   :  { %433 = vmatmul.mubr.f32.gmra.mrb[4].mxu0 %v69_v29 }
  0x62   :  { %435 = vmatprep.mubr.f32.mxu0 %v70_v30 }
  0x65   :  { %436 = vmatmul.mubr.f32.gmra.mrb[6].mxu0 %v71_v31 }
  0x66   :  { %438 = vmatprep.mubr.f32.mxu0 %v72_v32 }
  0x69   :  { %439 = vmatmul.mubr.f32.gmra.mrb[8].mxu0 %v73_v33 }
  0x6a   :  { %441 = vmatprep.mubr.f32.mxu0 %v74_v34 }
  0x6d   :  { %442 = vmatmul.mubr.f32.gmra.mrb[10].mxu0 %v75_v35 }
  0x6e   :  { %444 = vmatprep.mubr.f32.mxu0 %v76_v36 }
  0x71   :  { %445 = vmatmul.mubr.f32.gmra.mrb[12].mxu0 %v77_v37 }
  0x72   :  { %447 = vmatprep.mubr.f32.mxu0 %v78_v38 }
  0x75   :  { %448 = vmatmul.mubr.f32.gmra.mrb[14].mxu0 %v79_v39 }
 0x12c   :  { %v428_v42 = vpop.f32.mrb[0].mxu0 }
 0x12d   :  { %v162_v43 = vpop.f32.mrb[1].mxu0 }
 0x12e   :  { %v518_v44 = vpack.c.bf16 %v428_v42, %v162_v43 }
 0x130   :  { %v431_v45 = vpop.f32.mrb[2].mxu0  ;;  %519 = vmatpush3.bf16.msra.mxu1 %v518_v44 }
 0x131   :  { %v172_v46 = vpop.f32.mrb[3].mxu0  ;;  %520 = vmatprep.subr.bf16.mxu1 %v649_v40 }
 0x132   :  { %v521_v47 = vpack.c.bf16 %v431_v45, %v172_v46 }
 0x134   :  { %v434_v48 = vpop.f32.mrb[4].mxu0  ;;  %522 = vmatpush3.bf16.msra.mxu1 %v521_v47 }
 0x135   :  { %v182_v49 = vpop.f32.mrb[5].mxu0  ;;  %523 = vmatprep.subr.bf16.mxu1 %v649_v40 }
 0x136   :  { %v524_v50 = vpack.c.bf16 %v434_v48, %v182_v49 }
 0x138   :  { %v437_v51 = vpop.f32.mrb[6].mxu0  ;;  %525 = vmatpush3.bf16.msra.mxu1 %v524_v50 }
 0x139   :  { %v192_v52 = vpop.f32.mrb[7].mxu0  ;;  %526 = vmatprep.subr.bf16.mxu1 %v649_v40 }
 0x13a   :  { %v527_v53 = vpack.c.bf16 %v437_v51, %v192_v52 }
 0x13c   :  { %v440_v54 = vpop.f32.mrb[8].mxu0  ;;  %528 = vmatpush3.bf16.msra.mxu1 %v527_v53 }
 0x13d   :  { %v202_v55 = vpop.f32.mrb[9].mxu0  ;;  %529 = vmatprep.subr.bf16.mxu1 %v649_v40 }
 0x13e   :  { %v530_v56 = vpack.c.bf16 %v440_v54, %v202_v55 }
 0x140   :  { %v443_v57 = vpop.f32.mrb[10].mxu0  ;;  %531 = vmatpush3.bf16.msra.mxu1 %v530_v56 }
 0x141   :  { %v212_v58 = vpop.f32.mrb[11].mxu0  ;;  %532 = vmatprep.subr.bf16.mxu1 %v649_v40 }
 0x142   :  { %v533_v59 = vpack.c.bf16 %v443_v57, %v212_v58 }
 0x144   :  { %v446_v60 = vpop.f32.mrb[12].mxu0  ;;  %534 = vmatpush3.bf16.msra.mxu1 %v533_v59 }
 0x145   :  { %v222_v61 = vpop.f32.mrb[13].mxu0  ;;  %535 = vmatprep.subr.bf16.mxu1 %v649_v40 }
 0x146   :  { %v536_v62 = vpack.c.bf16 %v446_v60, %v222_v61 }
 0x148   :  { %v449_v63 = vpop.f32.mrb[14].mxu0  ;;  %537 = vmatpush3.bf16.msra.mxu1 %v536_v62 }
 0x149   :  { %v232_v0 = vpop.f32.mrb[15].mxu0  ;;  %538 = vmatprep.subr.bf16.mxu1 %v649_v40 }
 0x14a   :  { %v539_v1 = vpack.c.bf16 %v449_v63, %v232_v0 }
 0x14c   :  { %540 = vmatpush3.bf16.msra.mxu1 %v539_v1 }
 0x14f   :  { %483 = vmatmul.mubr.f32.vlgmr.msra.gmra.mrb[0].mxu1 %v242_v2 }
 0x222   :  { %v309_v4 = vpop.f32.mrb[0].mxu1 }
 0x223   :  { %v326_v5 = vadd.f32 %v344_v3, %v309_v4  ;;  %v484_v6 = vpop.f32.mrb[1].mxu1 }
 0x225   :  { %327 = vst [vmem:[#allocation9] sm:$0xff] %v326_v5 }
 0x226   :  { %627 = shalt.err (!%p624_p0)
}
 0x227   :  { %s628_s5 = scalar_lea.hbm %s739_s4, 128 }
 0x228   :  { %p629_p1 = scmp.ne.s32.totalorder %s739_s4, %s628_s5  ;;  %p632_p2 = scmp.lt.u32.totalorder %s628_s5, %s739_s4 }
 0x22a   :  { %p634_p3 = pnand %p632_p2, %p629_p1 }
 0x22c   :  { %637 = shalt.err (!%p634_p3)
}
 0x22d   :  { %337 = dma.vmem_to_hbm [thread:$0]  %s335_s27, 128, %s739_s4, [#allocation5]  }
 0x22e   :  { %642 = dma.done.wait [#allocation5], 128  }
 0x22f   :  { %643 = vsyncadd [#allocation5], 4294967168 }
 0x230   :  { %341 = vsyncpa [#allocation4], 1 }
 0x231   :  { %342 = vsyncpa [#allocation7], 1 }
 0x232   :  { %343 = vsyncpa [#allocation5], 1 }

</bundles_post_ra>
